<compile_context>
chip_gen: v7x
topology: tpu7x:2x2x1
jax: 0.10.0
libtpu: 0.0.40
codegen_flags: <defaults>
</compile_context>

<pallas_src>
import math

import jax
import jax.numpy as jnp
from jax.experimental import pallas as pl
from jax.experimental.pallas import tpu as pltpu

NEG_SLOPE = 0.01      # torch.nn.functional.leaky_relu default
MASK_FILL = -1e30     # fill value for masked (non-edge) scores
M_INIT = -1e28        # running-max init; MASK_FILL - M_INIT << 0 so exp underflows to 0 exactly
A_PAD = 128           # lane-dense width of the per-node attention-term slab


def _round_up(x, m):
    return ((x + m - 1) // m) * m


# ---------------------------------------------------------------------------
# Kernel 1: projection.  Two outputs per node-row tile:
#   z   = h @ Wz  (bf16, lane-dense d_pad slab; cols >= out_dim are zero)
#   att = h @ Wa  (f32;  col 0 = a_src.z  (source term), col 1 = a_dst.z (dest term))
# ---------------------------------------------------------------------------
def proj_kernel(h_ref, wz_ref, wa_ref, z_ref, att_ref):
    h = h_ref[...]
    z_ref[...] = jnp.dot(h.astype(jnp.bfloat16), wz_ref[...],
                         preferred_element_type=jnp.float32).astype(z_ref.dtype)
    # Attention-score path kept in f32 for accuracy (tiny matmul, not the bottleneck).
    att_ref[...] = jnp.dot(h, wa_ref[...], preferred_element_type=jnp.float32)


# ---------------------------------------------------------------------------
# Kernel 2: masked softmax over incoming edges + aggregation.
# Grid (dst tile i, src tile k); online (flash-style) softmax over the source axis.
# ---------------------------------------------------------------------------
def attn_kernel(z_ref, es_ref, ed_ref, adj_ref, out_ref, m_sc, l_sc, acc_sc):
    k = pl.program_id(1)

    @pl.when(k == 0)
    def _():
        m_sc[...] = jnp.full_like(m_sc, M_INIT)
        l_sc[...] = jnp.zeros_like(l_sc)
        acc_sc[...] = jnp.zeros_like(acc_sc)

    # scores[i, j] = a_dst.z_i + a_src.z_j   (f32, broadcast add — no XLU transpose)
    scores = ed_ref[...] + es_ref[...]                        # (tm, tk)
    e = jnp.where(scores >= 0, scores, NEG_SLOPE * scores)    # leaky_relu
    e_m = jnp.where(adj_ref[...] > 0, e, MASK_FILL)           # int8 {0,1} adjacency mask

    m_prev = m_sc[...]
    m_new = jnp.maximum(m_prev, jnp.max(e_m, axis=1, keepdims=True))
    a = jnp.exp(m_prev - m_new)                               # rescale factor for old stats
    p = jnp.exp(e_m - m_new)                                  # masked entries underflow to 0
    l_sc[...] = a * l_sc[...] + jnp.sum(p, axis=1, keepdims=True)
    acc_sc[...] = a * acc_sc[...] + jnp.dot(
        p.astype(jnp.bfloat16), z_ref[...], preferred_element_type=jnp.float32)
    m_sc[...] = m_new

    @pl.when(k == pl.num_programs(1) - 1)
    def _():
        # Columns >= out_dim are exactly zero (z pad cols are zero); wrapper slices them off.
        out_ref[...] = acc_sc[...] * pl.reciprocal(l_sc[...], approx=True)


def gat_layer(h, adj, w, a_src, a_dst, *, tile_m=256, tile_k=512):
    """h: (N, in_dim) f32; adj: (N, N), adj[i, j] = 1 iff edge src j -> dst i;
    w: (in_dim, out_dim) = fc.weight.T; a_src/a_dst: (out_dim, 1) halves of attn_fc.weight.
    Returns (N, out_dim) f32.
    Preconditions: every node has at least one in-edge (e.g. self loop); tile_m / tile_k
    should be power-of-two multiples of 8 / 128 (use tile_m=128 on v5e)."""
    N, in_dim = h.shape
    out_dim = w.shape[1]

    d_pad = _round_up(out_dim, 128)              # lane-dense z / output slab width
    n8 = _round_up(N, 8)
    tm = min(tile_m, n8)                         # dst-row tile (multiple of 8)

    if n8 <= max(tile_k, 128):
        n_pad = _round_up(n8, tm)
        tk = n_pad                               # single source tile (full-dim block)
    else:
        n_pad = _round_up(n8, math.lcm(tm, 128))
        tk = max(128, tile_k - tile_k % 128)     # largest multiple of 128 <= tile_k dividing n_pad
        while n_pad % tk:
            tk -= 128
    grid_m = n_pad // tm
    grid_k = n_pad // tk

    # Projection weights: z slab (bf16) + narrow f32 attention-term slab.
    wz = jnp.zeros((in_dim, d_pad), jnp.float32).at[:, :out_dim].set(w).astype(jnp.bfloat16)
    wa = jnp.zeros((in_dim, A_PAD), jnp.float32)
    wa = wa.at[:, 0].set((w @ a_src)[:, 0])
    wa = wa.at[:, 1].set((w @ a_dst)[:, 0])

    h_pad = jnp.zeros((n_pad, in_dim), jnp.float32).at[:N, :].set(h.astype(jnp.float32))

    # int8 {0,1} adjacency, built directly in the compact dtype (no f32 N^2 intermediate).
    adj_i8 = jnp.zeros((n_pad, n_pad), jnp.int8).at[:N, :N].set((adj > 0).astype(jnp.int8))

    # --- kernel 1: projection, tiled over node rows ---
    z_bf16, att = pl.pallas_call(
        proj_kernel,
        out_shape=(jax.ShapeDtypeStruct((n_pad, d_pad), jnp.bfloat16),
                   jax.ShapeDtypeStruct((n_pad, A_PAD), jnp.float32)),
        grid_spec=pltpu.PrefetchScalarGridSpec(
            num_scalar_prefetch=0,
            grid=(grid_m,),
            in_specs=[
                pl.BlockSpec((tm, in_dim), lambda i: (i, 0)),
                pl.BlockSpec((in_dim, d_pad), lambda i: (0, 0)),
                pl.BlockSpec((in_dim, A_PAD), lambda i: (0, 0)),
            ],
            out_specs=[
                pl.BlockSpec((tm, d_pad), lambda i: (i, 0)),
                pl.BlockSpec((tm, A_PAD), lambda i: (i, 0)),
            ],
        ),
        compiler_params=pltpu.CompilerParams(
            dimension_semantics=("parallel",)),
    )(h_pad, wz, wa)

    # Layout plumbing only (O(N), no FLOPs): source term as a lane row, dest term as a column.
    es_row = att[:, 0].reshape(1, n_pad)         # (1, N_pad)  a_src . z_j
    ed_col = att[:, 1].reshape(n_pad, 1)         # (N_pad, 1)  a_dst . z_i

    # VMEM budget for the attention kernel (double-buffered blocks + scratch).
    attn_vmem = (2 * tk * d_pad * 2              # z tile (bf16)
                 + 2 * tk * 4                    # es row tile
                 + 2 * tm * 4                    # ed column tile
                 + 2 * tm * tk * 1               # adj tile (int8)
                 + 2 * tm * d_pad * 4            # output tile
                 + 2 * tm * 4                    # m / l scratch
                 + tm * d_pad * 4)               # accumulator scratch
    vmem_limit = int(min(max(2 * attn_vmem + (4 << 20), 32 << 20), 128 << 20))

    # --- kernel 2: online masked softmax + aggregation, tiled over (dst rows, src cols) ---
    out_pad = pl.pallas_call(
        attn_kernel,
        out_shape=jax.ShapeDtypeStruct((n_pad, d_pad), jnp.float32),
        grid_spec=pltpu.PrefetchScalarGridSpec(
            num_scalar_prefetch=0,
            grid=(grid_m, grid_k),
            in_specs=[
                pl.BlockSpec((tk, d_pad), lambda i, k: (k, 0)),   # z of this source tile
                pl.BlockSpec((1, tk), lambda i, k: (0, k)),       # es of this source tile
                pl.BlockSpec((tm, 1), lambda i, k: (i, 0)),       # ed of this dst tile
                pl.BlockSpec((tm, tk), lambda i, k: (i, k)),      # adjacency tile (int8)
            ],
            out_specs=pl.BlockSpec((tm, d_pad), lambda i, k: (i, 0)),
            scratch_shapes=[pltpu.VMEM((tm, 1), jnp.float32),     # running max
                            pltpu.VMEM((tm, 1), jnp.float32),     # running denominator
                            pltpu.VMEM((tm, d_pad), jnp.float32)],  # accumulator
        ),
        compiler_params=pltpu.CompilerParams(
            dimension_semantics=("parallel", "arbitrary"),
            vmem_limit_bytes=vmem_limit),
    )(z_bf16, es_row, ed_col, adj_i8)

    return out_pad[:N, :out_dim]


def xavier_normal(key, shape, gain):
    # matches torch.nn.init.xavier_normal_ for a (fan_out, fan_in) weight
    fan_out, fan_in = shape
    std = gain * (2.0 / (fan_in + fan_out)) ** 0.5
    return std * jax.random.normal(key, shape, dtype=jnp.float32)


def reference(h, adj, w, a_src, a_dst):
    z = h @ w
    scores = (z @ a_dst) + (z @ a_src).T
    e = jnp.where(scores >= 0, scores, NEG_SLOPE * scores)
    mask = adj > 0
    e_m = jnp.where(mask, e, MASK_FILL)
    p = jnp.exp(e_m - jnp.max(e_m, axis=1, keepdims=True))
    p = jnp.where(mask, p, 0.0)
    alpha = p / jnp.sum(p, axis=1, keepdims=True)
    return alpha @ z


if __name__ == "__main__":
    N, in_dim, out_dim = 8, 16, 32
    key = jax.random.PRNGKey(0)
    k_h, k_fc, k_attn, k_adj = jax.random.split(key, 4)

    # node features
    h = jax.random.normal(k_h, (N, in_dim), dtype=jnp.float32)

    # parameters (xavier_normal_ with gain = calculate_gain('relu') = sqrt(2))
    gain = 2.0 ** 0.5
    fc_w = xavier_normal(k_fc, (out_dim, in_dim), gain)          # nn.Linear(in_dim, out_dim).weight
    attn_w = xavier_normal(k_attn, (1, 2 * out_dim), gain)       # nn.Linear(2*out_dim, 1).weight
    w = fc_w.T                                                   # (in_dim, out_dim)
    a_src = attn_w[0, :out_dim].reshape(out_dim, 1)              # acts on edges.src['z']
    a_dst = attn_w[0, out_dim:].reshape(out_dim, 1)              # acts on edges.dst['z']

    # synthetic graph: random edges + self loops (adj[i, j] = 1 means edge j -> i)
    adj = (jax.random.uniform(k_adj, (N, N)) < 0.4).astype(jnp.float32)
    adj = jnp.maximum(adj, jnp.eye(N, dtype=jnp.float32))
    assert bool(jnp.all(adj.sum(axis=1) > 0))   # precondition: every node has >= 1 in-edge

    out = jax.block_until_ready(gat_layer(h, adj, w, a_src, a_dst))
    ref = reference(h, adj, w, a_src, a_dst)

    assert out.shape == (N, out_dim)
    # bf16 MXU operands (z, alpha) + approx=True reciprocal loosen bit-exactness vs the
    # pure-f32 reference; the score/softmax path itself is f32.
    err = float(jnp.max(jnp.abs(out - ref)))
    assert jnp.allclose(out, ref, atol=2e-2, rtol=2e-2), err

    print("KERNEL_OK")
</pallas_src>

<mosaic_0001>
module attributes {stable_mosaic.version = 11 : i64} {
  func.func @proj_kernel(%arg0: i32, %arg1: memref<8x16xf32, #tpu.memory_space<vmem>>, %arg2: memref<16x128xbf16, #tpu.memory_space<vmem>>, %arg3: memref<16x128xf32, #tpu.memory_space<vmem>>, %arg4: memref<8x128xbf16, #tpu.memory_space<vmem>>, %arg5: memref<8x128xf32, #tpu.memory_space<vmem>>) attributes {dimension_semantics = [#tpu.dimension_semantics<parallel>], iteration_bounds = array<i64: 1>, scalar_prefetch = 0 : i64, scratch_operands = 0 : i64, tpu.core_type = #tpu.core_type<tc>, window_params = [{transform_indices = @transform_0, window_bounds = array<i64: 8, 16>}, {pipeline_mode = #tpu.pipeline_mode<synchronous>, transform_indices = @transform_1, window_bounds = array<i64: 16, 128>}, {pipeline_mode = #tpu.pipeline_mode<synchronous>, transform_indices = @transform_2, window_bounds = array<i64: 16, 128>}, {transform_indices = @transform_3, window_bounds = array<i64: 8, 128>}, {transform_indices = @transform_4, window_bounds = array<i64: 8, 128>}]} {
    %c0 = arith.constant 0 : index
    %c0_0 = arith.constant 0 : index
    %0 = vector.load %arg1[%c0, %c0_0] : memref<8x16xf32, #tpu.memory_space<vmem>>, vector<8x16xf32>
    %1 = arith.truncf %0 : vector<8x16xf32> to vector<8x16xbf16>
    %c0_1 = arith.constant 0 : index
    %c0_2 = arith.constant 0 : index
    %2 = vector.load %arg2[%c0_1, %c0_2] : memref<16x128xbf16, #tpu.memory_space<vmem>>, vector<16x128xbf16>
    %cst = arith.constant dense<0.000000e+00> : vector<8x128xf32>
    %3 = tpu.matmul %1, %2, %cst {dimension_numbers = #tpu.dot_dimension_numbers<[1], [0], [0], [1], [0, 0, 1, 1], [], []>} : vector<8x16xbf16>, vector<16x128xbf16>, vector<8x128xf32> -> vector<8x128xf32>
    %4 = arith.truncf %3 : vector<8x128xf32> to vector<8x128xbf16>
    %c0_3 = arith.constant 0 : index
    %c0_4 = arith.constant 0 : index
    %5 = vector.load %arg4[%c0_3, %c0_4] : memref<8x128xbf16, #tpu.memory_space<vmem>>, vector<8x128xbf16>
    tpu.vector_store %arg4[%c0_3, %c0_4], %4 {strides = array<i32>} : memref<8x128xbf16, #tpu.memory_space<vmem>>, vector<8x128xbf16>,
    %c0_5 = arith.constant 0 : index
    %c0_6 = arith.constant 0 : index
    %6 = vector.load %arg3[%c0_5, %c0_6] : memref<16x128xf32, #tpu.memory_space<vmem>>, vector<16x128xf32>
    %cst_7 = arith.constant dense<0.000000e+00> : vector<8x128xf32>
    %7 = tpu.matmul %0, %6, %cst_7 {dimension_numbers = #tpu.dot_dimension_numbers<[1], [0], [0], [1], [0, 0, 1, 1], [], []>} : vector<8x16xf32>, vector<16x128xf32>, vector<8x128xf32> -> vector<8x128xf32>
    %c0_8 = arith.constant 0 : index
    %c0_9 = arith.constant 0 : index
    %8 = vector.load %arg5[%c0_8, %c0_9] : memref<8x128xf32, #tpu.memory_space<vmem>>, vector<8x128xf32>
    tpu.vector_store %arg5[%c0_8, %c0_9], %7 {strides = array<i32>} : memref<8x128xf32, #tpu.memory_space<vmem>>, vector<8x128xf32>,
    return
  }
  func.func @transform_0(%arg0: i32) -> (i32, i32) {
    %c0_i32 = arith.constant 0 : i32
    %c0_i32_0 = arith.constant 0 : i32
    return %arg0, %c0_i32 : i32, i32
  }
  func.func @transform_1(%arg0: i32) -> (i32, i32) {
    %c0_i32 = arith.constant 0 : i32
    %c0_i32_0 = arith.constant 0 : i32
    %c0_i32_1 = arith.constant 0 : i32
    return %c0_i32, %c0_i32_0 : i32, i32
  }
  func.func @transform_2(%arg0: i32) -> (i32, i32) {
    %c0_i32 = arith.constant 0 : i32
    %c0_i32_0 = arith.constant 0 : i32
    %c0_i32_1 = arith.constant 0 : i32
    return %c0_i32, %c0_i32_0 : i32, i32
  }
  func.func @transform_3(%arg0: i32) -> (i32, i32) {
    %c0_i32 = arith.constant 0 : i32
    %c0_i32_0 = arith.constant 0 : i32
    return %arg0, %c0_i32 : i32, i32
  }
  func.func @transform_4(%arg0: i32) -> (i32, i32) {
    %c0_i32 = arith.constant 0 : i32
    %c0_i32_0 = arith.constant 0 : i32
    return %arg0, %c0_i32 : i32, i32
  }
}

</mosaic_0001>

<bundles_post_ra>
// kernel: tpu_custom_call.1
= control target key start
LH: loop header
LB: loop body
LE: loop exit
PB: predicated region body
PF: predicated region fallthrough
CT: control target
= control target key end

     0   :  { %10 = vsyncpa [#allocation3], 0  ;;  %s479_s0 = inlined_call_operand.hbm [shape: f32[8,16], index: 0, kind: input, shape index: {}]   ;;  %s480_s1 = inlined_call_operand.hbm [shape: bf16[16,128], index: 1, kind: input, shape index: {}]   ;;  %s481_s2 = inlined_call_operand.hbm [shape: f32[16,128], index: 2, kind: input, shape index: {}]   ;;  %s482_s3 = inlined_call_operand.hbm [shape: bf16[8,128], index: 3, kind: output, shape index: {0}]   ;;  %s483_s4 = inlined_call_operand.hbm [shape: f32[8,128], index: 4, kind: output, shape index: {1}]  }
   0x1   :  { %11 = vsyncpa [#allocation6], 0 }
   0x2   :  { %12 = vsyncpa [#allocation4], 0 }
   0x3   :  { %13 = vsyncpa [#allocation10], 0  ;;  %s375_s15 = smov [#allocation5]   ;;  %s257_s19 = scalar_lea.hbm %s480_s1, 128 }
   0x4   :  { %s29_s16 = sshll.u32 %s375_s15, 4  ;;  %p258_p0 = scmp.ne.s32.totalorder %s480_s1, %s257_s19  ;;  %s30_s16 = int_to_ptr.vmem [resolvable:$true] %s29_s16 }
   0x5   :  { %p261_p1 = scmp.lt.u32.totalorder %s257_s19, %s480_s1 }
   0x7   :  { %p263_p2 = pnand %p261_p1, %p258_p0 }
   0x9   :  { %266 = shalt.err (!%p263_p2)
}
   0xa   :  { %s267_s24 = scalar_lea.vmem %s30_s16, 128  ;;  %p272_p4 = scmp.lt.s32.totalorder %s30_s16, %s30_s16 }
   0xb   :  { %p268_p3 = scmp.ne.s32.totalorder %s30_s16, %s267_s24  ;;  %p273_p5 = scmp.lt.s32.totalorder %s267_s24, %s267_s24 }
   0xd   :  { %p274_p6 = por %p273_p5, %p272_p4 }
   0xf   :  { %p275_p7 = pnand %p274_p6, %p268_p3 }
  0x11   :  { %278 = shalt.err (!%p275_p7)
}
  0x12   :  { %s376_s25 = smov 64   ;;  %s377_s26 = smov 4  }
  0x13   :  { %35 = dma.hbm_to_vmem [thread:$0]  %s480_s1, 128, %s30_s16, [#allocation6], %s376_s25, %s376_s25, %s377_s26  }
  0x14   :  { %s378_s29 = smov [#allocation2]   ;;  %s379_s5 = smov [#allocation7]  }
  0x15   :  { %s20_s30 = sshll.u32 %s378_s29, 4  ;;  %s41_s6 = sshll.u32 %s379_s5, 4  ;;  %s21_s30 = int_to_ptr.vmem [resolvable:$true] %s20_s30  ;;  %s42_s6 = int_to_ptr.vmem [resolvable:$true] %s41_s6 }
  0x16   :  { %s279_s9 = scalar_lea.hbm %s479_s0, 128 }
  0x17   :  { %p280_p8 = scmp.ne.s32.totalorder %s479_s0, %s279_s9  ;;  %p283_p9 = scmp.lt.u32.totalorder %s279_s9, %s479_s0 }
  0x19   :  { %p285_p10 = pnand %p283_p9, %p280_p8 }
  0x1b   :  { %288 = shalt.err (!%p285_p10)
}
  0x1c   :  { %s289_s1 = scalar_lea.vmem %s21_s30, 128  ;;  %p294_p12 = scmp.lt.s32.totalorder %s21_s30, %s21_s30 }
  0x1d   :  { %p290_p11 = scmp.ne.s32.totalorder %s21_s30, %s289_s1  ;;  %p295_p13 = scmp.lt.s32.totalorder %s289_s1, %s289_s1 }
  0x1f   :  { %p296_p0 = por %p295_p13, %p294_p12 }
  0x21   :  { %p297_p1 = pnand %p296_p0, %p290_p11 }
  0x23   :  { %300 = shalt.err (!%p297_p1)
}
  0x24   :  { %23 = dma.hbm_to_vmem [thread:$0]  %s479_s0, 128, %s21_s30, [#allocation3]  }
  0x25   :  { %s301_s18 = scalar_lea.hbm %s481_s2, 256 }
  0x26   :  { %p302_p2 = scmp.ne.s32.totalorder %s481_s2, %s301_s18  ;;  %p305_p3 = scmp.lt.u32.totalorder %s301_s18, %s481_s2 }
  0x28   :  { %p307_p4 = pnand %p305_p3, %p302_p2 }
  0x2a   :  { %310 = shalt.err (!%p307_p4)
}
  0x2b   :  { %s311_s23 = scalar_lea.vmem %s42_s6, 256  ;;  %p316_p6 = scmp.lt.s32.totalorder %s42_s6, %s42_s6 }
  0x2c   :  { %p312_p5 = scmp.ne.s32.totalorder %s42_s6, %s311_s23  ;;  %p317_p7 = scmp.lt.s32.totalorder %s311_s23, %s311_s23 }
  0x2e   :  { %p318_p8 = por %p317_p7, %p316_p6 }
  0x30   :  { %p319_p9 = pnand %p318_p8, %p312_p5 }
  0x32   :  { %322 = shalt.err (!%p319_p9)
}
  0x33   :  { %s380_s0 = smov 128   ;;  %s381_s24 = smov 8  }
  0x34   :  { %47 = dma.hbm_to_vmem [thread:$0]  %s481_s2, 256, %s42_s6, [#allocation6], %s380_s0, %s380_s0, %s381_s24  }
  0x35   :  { %367 = dma.done.wait [#allocation3], 128  }
  0x36   :  { %368 = vsyncadd [#allocation3], 4294967168 }
  0x37   :  { %369 = dma.done.wait [#allocation6], 384  }
  0x38   :  { %370 = vsyncadd [#allocation6], 4294966912  ;;  %v382_v0 = vmov 0.0   ;;  %v383_v1 = vmov 0.0|0.0   ;;  %vm384_vm0 = vmmov 0   ;;  %v256_v2 = vld [vmem:[#allocation5] sm:$0xff]  }
  0x39   :  { %228 = vmatprep.subr.bf16.mxu0 %v382_v0  ;;  %241 = vmatprep.subr.bf16.mxu1 %v383_v1  ;;  %v114_v3 = vld [vmem:[#allocation7] sm:$0xff]  ;;  %v115_v4 = vld [vmem:[#allocation7 + $0x8] sm:$0xff]  ;;  %v58_v5 = vld [vmem:[#allocation2] sm:$0xff]  ;;  %vm68_vm1 = vcmask 130048   ;;  %s385_s2 = smov [#allocation8]   ;;  %s386_s28 = smov [#allocation9]  }
  0x3a   :  { %230 = vmatprep.mubr.msk.bf16.mxu0 %vm384_vm0, %v382_v0  ;;  %238 = vmatprep.mubr.msk.f32.mxu1 %vm384_vm0, %v382_v0  ;;  %v242_v6 = vpack.c.bf16 %v115_v4, %v114_v3  ;;  %v59_v7 = vpack.c.bf16 %v58_v5, %v58_v5  ;;  %s196_s27 = sshll.u32 %s385_s2, 4  ;;  %s206_s29 = sshll.u32 %s386_s28, 4  ;;  %s197_s27 = int_to_ptr.vmem [resolvable:$true] %s196_s27  ;;  %s448_s29 = int_to_ptr.vmem [resolvable:$true] %s206_s29 }
  0x3b   :  { %229 = vmatpush3.bf16.msra.mxu0 %v256_v2  ;;  %s323_s30 = scalar_lea.vmem %s197_s27, 64  ;;  %p328_p11 = scmp.lt.s32.totalorder %s197_s27, %s197_s27 }
  0x3c   :  { %243 = vmatpush3.bf16.msra.mxu1 %v242_v6  ;;  %p324_p10 = scmp.ne.s32.totalorder %s197_s27, %s323_s30  ;;  %p329_p12 = scmp.lt.s32.totalorder %s323_s30, %s323_s30 }
  0x3e   :  { %231 = vmatmul.mubr.msk.bf16.vlgmr.msra.gmra.mrb[0].mxu0 %vm68_vm1, %v59_v7  ;;  %p330_p13 = por %p329_p12, %p328_p11 }
  0x3f   :  { %239 = vmatmul.mubr.msk.f32.vlgmr.msra.gmra.mrb[0].mxu1 %vm68_vm1, %v58_v5 }
  0x40   :  { %p331_p0 = pnand %p330_p13, %p324_p10 }
 0x111   :  { %v106_v8 = vpop.f32.mrb[0].mxu0 }
 0x112   :  { %v112_v9 = vpack.c.bf16 %v106_v8, %v106_v8  ;;  %v232_v10 = vpop.f32.mrb[1].mxu0  ;;  %v185_v11 = vpop.f32.mrb[0].mxu1 }
 0x113   :  { %v109_v12 = vpop.f32.mrb[2].mxu0  ;;  %189 = vst [vmem:[#allocation9] sm:$0xff] %v185_v11  ;;  %v240_v13 = vpop.f32.mrb[1].mxu1 }
 0x114   :  { %113 = vst [vmem:[#allocation8] sm:$0xf] %v112_v9  ;;  %v233_v14 = vpop.f32.mrb[3].mxu0 }
 0x115   :  { %334 = shalt.err (!%p331_p0)
}
 0x116   :  { %s335_s7 = scalar_lea.hbm %s482_s3, 64 }
 0x117   :  { %p336_p1 = scmp.ne.s32.totalorder %s482_s3, %s335_s7  ;;  %p339_p2 = scmp.lt.u32.totalorder %s335_s7, %s482_s3 }
 0x119   :  { %p341_p3 = pnand %p339_p2, %p336_p1 }
 0x11b   :  { %344 = shalt.err (!%p341_p3)
}
 0x11c   :  { %199 = dma.vmem_to_hbm [thread:$0]  %s197_s27, 64, %s482_s3, [#allocation4]  }
 0x11d   :  { %s345_s1 = scalar_lea.vmem %s448_s29, 128  ;;  %p350_p5 = scmp.lt.s32.totalorder %s448_s29, %s448_s29 }
 0x11e   :  { %p346_p4 = scmp.ne.s32.totalorder %s448_s29, %s345_s1  ;;  %p351_p6 = scmp.lt.s32.totalorder %s345_s1, %s345_s1 }
 0x120   :  { %p352_p7 = por %p351_p6, %p350_p5 }
 0x122   :  { %p353_p8 = pnand %p352_p7, %p346_p4 }
 0x124   :  { %356 = shalt.err (!%p353_p8)
}
 0x125   :  { %s357_s16 = scalar_lea.hbm %s483_s4, 128 }
 0x126   :  { %p358_p9 = scmp.ne.s32.totalorder %s483_s4, %s357_s16  ;;  %p361_p10 = scmp.lt.u32.totalorder %s357_s16, %s483_s4 }
 0x128   :  { %p363_p11 = pnand %p361_p10, %p358_p9 }
 0x12a   :  { %366 = shalt.err (!%p363_p11)
}
 0x12b   :  { %209 = dma.vmem_to_hbm [thread:$0]  %s448_s29, 128, %s483_s4, [#allocation10]  }
 0x12c   :  { %371 = dma.done.wait [#allocation4], 64  }
 0x12d   :  { %372 = vsyncadd [#allocation4], 4294967232 }
 0x12e   :  { %373 = dma.done.wait [#allocation10], 128  }
 0x12f   :  { %374 = vsyncadd [#allocation10], 4294967168 }
 0x130   :  { %216 = vsyncpa [#allocation3], 1 }
 0x131   :  { %217 = vsyncpa [#allocation6], 1 }
 0x132   :  { %218 = vsyncpa [#allocation4], 1 }
 0x133   :  { %219 = vsyncpa [#allocation10], 1 }

</bundles_post_ra>
